<compile_context>
chip_gen: v7x
topology: tpu7x:2x2x1
jax: 0.10.0
libtpu: 0.0.40
codegen_flags: <defaults>
</compile_context>

<pallas_src>
import math
import numpy as np
import jax
import jax.numpy as jnp
from jax.experimental import pallas as pl
from jax.experimental.pallas import tpu as pltpu

CUTOFF = 2.0
MAX_NUM_NEIGHBORS = 32
ADD_SELF_LOOPS = True


def _round_up(x, m):
    return ((x + m - 1) // m) * m


def _distance_mask_kernel(tril_ref, pos_col_ref, pos_row_ref,
                          batch_col_ref, batch_row_ref,
                          mask_ref, carry_ref):
    tm = pos_col_ref.shape[0]
    tn = pos_row_ref.shape[1]
    i_tile = pl.program_id(1)        # row tile index (sequential / "arbitrary")

    # Reset the per-column running neighbor count at the first row tile.
    @pl.when(i_tile == 0)
    def _():
        carry_ref[...] = jnp.zeros_like(carry_ref)

    pos_col = pos_col_ref[...]                       # [tm, 3]  (sources i)
    pos_row = pos_row_ref[...]                       # [3, tn]  (targets j)

    # pairwise vector differences: vec(i, j) = pos[i] - pos[j]
    dx = pos_col[:, 0:1] - pos_row[0:1, :]           # [tm, tn]
    dy = pos_col[:, 1:2] - pos_row[1:2, :]
    dz = pos_col[:, 2:3] - pos_row[2:3, :]
    d2 = dx * dx + dy * dy + dz * dz                 # [tm, tn]

    # same-molecule mask and cutoff on squared distance (self-loops have
    # d2 == 0 <= cutoff^2, so add_self_loops=True keeps them automatically).
    same_mol = batch_col_ref[...] == batch_row_ref[...]           # [tm, tn]
    pre_mask = jnp.logical_and(same_mol, d2 <= CUTOFF * CUTOFF)

    if not ADD_SELF_LOOPS:
        j_tile = pl.program_id(0)
        gi = jax.lax.broadcasted_iota(jnp.int32, (tm, tn), 0) + i_tile * tm
        gj = jax.lax.broadcasted_iota(jnp.int32, (tm, tn), 1) + j_tile * tn
        pre_mask = jnp.logical_and(pre_mask, gi != gj)

    # Cap neighbors per target node j (column) at MAX_NUM_NEIGHBORS, keeping
    # the lowest source indices.  Blocked inclusive prefix:
    #   rank[r, c] = carry[c] + #kept rows <= r within this tile,
    # via a VMEM-resident lower-triangular bf16 matmul (exact 0/1 inputs,
    # f32 accumulation -- exact while per-column counts stay < 2^24).
    # TODO(synk): torch_cluster keeps an implementation-defined subset when the
    # cap binds (and radius_graph(loop=True) never lets the self-loop consume a
    # slot); here we deterministically keep the first MAX_NUM_NEIGHBORS sources
    # in index order (identical whenever the cap does not bind).
    mask_bf = pre_mask.astype(jnp.bfloat16)                        # [tm, tn]
    carry = carry_ref[...]                                         # [1, tn]
    rank = carry + jnp.dot(tril_ref[...], mask_bf,
                           preferred_element_type=jnp.float32)     # [tm, tn]
    kept = jnp.logical_and(pre_mask, rank <= float(MAX_NUM_NEIGHBORS))

    # Last prefix row == carry + this tile's pre-cap per-column counts.
    carry_ref[...] = rank[tm - 1:tm, :]
    mask_ref[...] = kept.astype(jnp.int8)


def _vmem_limit_bytes(tm, tn):
    tile = tm * tn
    # double-buffered I/O + full-tile f32/bf16 intermediates, 2x headroom
    io = 2 * (2 * tm * tm + 16 * tm + 16 * tn + 4 * tm + 4 * tn + tile)
    tmp = 10 * 4 * tile
    return int(min(64 * 1024 * 1024, max(32 * 1024 * 1024, 2 * (io + tmp))))


def _pick_tiles(N, tile_m, tile_n):
    """Lane-dense tiles; >=2 column tiles when possible (v7x megacore);
    minimal lcm-based padding (prefer the candidate with the smaller n_pad)."""
    n128 = _round_up(N, 128)
    tn = min(tile_n, n128)
    if n128 >= 256:
        tn = min(tn, max(128, ((n128 // 2) // 128) * 128))
    best = None
    for tm in sorted({min(tile_m, n128), tn}):
        n_pad = _round_up(N, (tm * tn) // math.gcd(tm, tn))
        key = (n_pad, -tm)
        if best is None or key < best[0]:
            best = (key, tm, tn, n_pad)
    return best[1], best[2], best[3]


def distance_mask(pos, batch, *, tile_m=256, tile_n=1024):
    """Runs the Pallas kernel; returns the dense int8 adjacency mask [N, N]
    with mask[i, j] = 1 iff there is an edge from source i to target j."""
    N = pos.shape[0]
    tm, tn, n_pad = _pick_tiles(N, tile_m, tile_n)

    pos_f = pos.astype(jnp.float32)
    pos_col = jnp.zeros((n_pad, 3), jnp.float32).at[:N].set(pos_f)   # [Np, 3]
    pos_row = pos_col.T                                              # [3, Np]
    batch_pad = jnp.full((n_pad,), -1, jnp.int32).at[:N].set(
        batch.astype(jnp.int32))              # pads (-1) never match real nodes
    batch_col = batch_pad.reshape(n_pad, 1)
    batch_row = batch_pad.reshape(1, n_pad)
    tril = jnp.tril(jnp.ones((tm, tm), jnp.bfloat16))   # loop-invariant prefix matrix

    grid = (n_pad // tn, n_pad // tm)   # (col tiles [parallel], row tiles [arbitrary])

    mask = pl.pallas_call(
        _distance_mask_kernel,
        grid_spec=pltpu.PrefetchScalarGridSpec(
            num_scalar_prefetch=0,
            grid=grid,
            in_specs=[
                pl.BlockSpec((tm, tm), lambda j, i: (0, 0)),   # tril: VMEM-resident
                pl.BlockSpec((tm, 3), lambda j, i: (i, 0)),
                pl.BlockSpec((3, tn), lambda j, i: (0, j)),
                pl.BlockSpec((tm, 1), lambda j, i: (i, 0)),
                pl.BlockSpec((1, tn), lambda j, i: (0, j)),
            ],
            out_specs=pl.BlockSpec((tm, tn), lambda j, i: (i, j)),
            scratch_shapes=[pltpu.VMEM((1, tn), jnp.float32)],
        ),
        out_shape=jax.ShapeDtypeStruct((n_pad, n_pad), jnp.int8),
        compiler_params=pltpu.CompilerParams(
            dimension_semantics=("parallel", "arbitrary"),
            vmem_limit_bytes=_vmem_limit_bytes(tm, tn)),
    )(tril, pos_col, pos_row, batch_col, batch_row)

    # Padded rows/columns (batch=-1, pos=0) produce kept pad-pad pairs; the
    # [:N, :N] slice is what makes the dense mask correct -- keep it.
    return mask[:N, :N]


def extract_edges(pos, mask):
    """Glue: dense int8 mask -> (edge_index, edge_weight, edge_vec).

    Edges are grouped by target node (edge_index[1]), mirroring radius_graph's
    per-query grouping; the edge *set* matches PyG exactly whenever the
    neighbor cap does not bind.  edge_vec / edge_weight are O(E) gathers from
    pos (the kernel no longer writes dense N x N float planes)."""
    mask_np = np.asarray(mask).astype(bool)
    pos_np = np.asarray(pos, dtype=np.float32)
    dst, src = np.nonzero(mask_np.T)          # sorted by target, then source
    edge_index = np.stack([src, dst], axis=0).astype(np.int64)   # [2, E]
    edge_vec = pos_np[src] - pos_np[dst]                         # [E, 3]
    # PyTorch zeroes self-loop weights explicitly (norm of zero vec is 0 anyway).
    edge_weight = np.where(src == dst, np.float32(0.0),
                           np.linalg.norm(edge_vec, axis=-1)).astype(np.float32)
    return edge_index, edge_weight, edge_vec


def _reference_mask(pos_np, batch_np):
    """Pure-numpy reference of the dense adjacency (incl. deterministic cap)."""
    pos_np = pos_np.astype(np.float32)
    diff = pos_np[:, None, :] - pos_np[None, :, :]
    d2 = (diff[..., 0] * diff[..., 0] + diff[..., 1] * diff[..., 1]
          + diff[..., 2] * diff[..., 2]).astype(np.float32)
    m = (batch_np[:, None] == batch_np[None, :]) & (d2 <= np.float32(CUTOFF * CUTOFF))
    if not ADD_SELF_LOOPS:
        m &= ~np.eye(pos_np.shape[0], dtype=bool)
    rank = np.cumsum(m.astype(np.int64), axis=0)   # inclusive prefix per column
    return m & (rank <= MAX_NUM_NEIGHBORS)


def _check_case(pos, batch, **tile_kwargs):
    mask = distance_mask(pos, batch, **tile_kwargs)
    mask = jax.block_until_ready(mask)
    edge_index, edge_weight, edge_vec = extract_edges(pos, mask)

    m_ref = _reference_mask(np.asarray(pos), np.asarray(batch))
    assert np.array_equal(np.asarray(mask).astype(bool), m_ref), "adjacency mismatch"
    src, dst = edge_index
    pos_np = np.asarray(pos, dtype=np.float32)
    vec_ref = pos_np[src] - pos_np[dst]
    np.testing.assert_allclose(edge_vec, vec_ref, rtol=0, atol=0)
    np.testing.assert_allclose(edge_weight, np.linalg.norm(vec_ref, axis=-1),
                               rtol=1e-6, atol=0)
    # self-loop weights must be exactly zero (PyTorch zeroes them explicitly)
    assert np.all(edge_weight[src == dst] == 0.0)


if __name__ == "__main__":
    key = jax.random.PRNGKey(0)
    k1, k2 = jax.random.split(key)

    # Case 1: 2 molecules x 8 atoms (single tile, cap never binds).
    N1 = 16
    pos1 = jax.random.uniform(k1, (N1, 3), jnp.float32, minval=-1.5, maxval=1.5)
    pos1 = jnp.round(pos1 * 64.0) / 64.0   # grid-snap -> exact d2, no cutoff ties
    batch1 = jnp.concatenate([jnp.zeros(8, jnp.int32), jnp.ones(8, jnp.int32)])
    _check_case(pos1, batch1)

    # Case 2: 2 molecules x 100 atoms, default tiles -> exercises the
    # >=2-column-tile (megacore) path and the neighbor cap.
    N2 = 200
    pos2 = jax.random.uniform(k2, (N2, 3), jnp.float32, minval=-1.5, maxval=1.5)
    pos2 = jnp.round(pos2 * 64.0) / 64.0
    batch2 = jnp.concatenate([jnp.zeros(100, jnp.int32), jnp.ones(100, jnp.int32)])
    _check_case(pos2, batch2)

    # Case 3: same data with small tiles -> multi-tile grid on both axes,
    # exercises the carried per-column rank prefix across row tiles.
    _check_case(pos2, batch2, tile_m=128, tile_n=128)

    print("KERNEL_OK")
</pallas_src>

<mosaic_0001>
module attributes {stable_mosaic.version = 11 : i64} {
  func.func @_distance_mask_kernel(%arg0: i32, %arg1: i32, %arg2: memref<128x128xbf16, #tpu.memory_space<vmem>>, %arg3: memref<128x3xf32, #tpu.memory_space<vmem>>, %arg4: memref<3x128xf32, #tpu.memory_space<vmem>>, %arg5: memref<128x1xi32, #tpu.memory_space<vmem>>, %arg6: memref<1x128xi32, #tpu.memory_space<vmem>>, %arg7: memref<128x128xi8, #tpu.memory_space<vmem>>, %arg8: memref<1x128xf32, #tpu.memory_space<vmem>>) attributes {dimension_semantics = [#tpu.dimension_semantics<parallel>, #tpu.dimension_semantics<arbitrary>], iteration_bounds = array<i64: 1, 1>, scalar_prefetch = 0 : i64, scratch_operands = 1 : i64, tpu.core_type = #tpu.core_type<tc>, window_params = [{pipeline_mode = #tpu.pipeline_mode<synchronous>, transform_indices = @transform_0, window_bounds = array<i64: 128, 128>}, {transform_indices = @transform_1, window_bounds = array<i64: 128, 3>}, {transform_indices = @transform_2, window_bounds = array<i64: 3, 128>}, {transform_indices = @transform_3, window_bounds = array<i64: 128, 1>}, {transform_indices = @transform_4, window_bounds = array<i64: 1, 128>}, {transform_indices = @transform_5, window_bounds = array<i64: 128, 128>}]} {
    %c0_i32 = arith.constant 0 : i32
    %0 = arith.cmpi eq, %arg1, %c0_i32 : i32
    %1 = arith.extui %0 : i1 to i32
    %c0_i32_0 = arith.constant 0 : i32
    %2 = arith.cmpi ne, %1, %c0_i32_0 : i32
    scf.if %2 {
      %cst_18 = arith.constant 0.000000e+00 : f32
      %48 = vector.broadcast %cst_18 : f32 to vector<1x128xf32>
      %c0_19 = arith.constant 0 : index
      %c0_20 = arith.constant 0 : index
      %49 = vector.load %arg8[%c0_19, %c0_20] : memref<1x128xf32, #tpu.memory_space<vmem>>, vector<1x128xf32>
      tpu.vector_store %arg8[%c0_19, %c0_20], %48 {strides = array<i32>} : memref<1x128xf32, #tpu.memory_space<vmem>>, vector<1x128xf32>,
    } else {
    }
    %c0 = arith.constant 0 : index
    %c0_1 = arith.constant 0 : index
    %3 = vector.load %arg3[%c0, %c0_1] : memref<128x3xf32, #tpu.memory_space<vmem>>, vector<128x3xf32>
    %c0_2 = arith.constant 0 : index
    %c0_3 = arith.constant 0 : index
    %4 = vector.load %arg4[%c0_2, %c0_3] : memref<3x128xf32, #tpu.memory_space<vmem>>, vector<3x128xf32>
    %5 = vector.extract_strided_slice %3 {offsets = [0, 0], sizes = [128, 1], strides = [1, 1]} : vector<128x3xf32> to vector<128x1xf32>
    %6 = vector.extract_strided_slice %4 {offsets = [0, 0], sizes = [1, 128], strides = [1, 1]} : vector<3x128xf32> to vector<1x128xf32>
    %7 = vector.broadcast %5 : vector<128x1xf32> to vector<128x128xf32>
    %8 = vector.broadcast %6 : vector<1x128xf32> to vector<128x128xf32>
    %9 = arith.subf %7, %8 : vector<128x128xf32>
    %10 = vector.extract_strided_slice %3 {offsets = [0, 1], sizes = [128, 1], strides = [1, 1]} : vector<128x3xf32> to vector<128x1xf32>
    %11 = vector.extract_strided_slice %4 {offsets = [1, 0], sizes = [1, 128], strides = [1, 1]} : vector<3x128xf32> to vector<1x128xf32>
    %12 = vector.broadcast %10 : vector<128x1xf32> to vector<128x128xf32>
    %13 = vector.broadcast %11 : vector<1x128xf32> to vector<128x128xf32>
    %14 = arith.subf %12, %13 : vector<128x128xf32>
    %15 = vector.extract_strided_slice %3 {offsets = [0, 2], sizes = [128, 1], strides = [1, 1]} : vector<128x3xf32> to vector<128x1xf32>
    %16 = vector.extract_strided_slice %4 {offsets = [2, 0], sizes = [1, 128], strides = [1, 1]} : vector<3x128xf32> to vector<1x128xf32>
    %17 = vector.broadcast %15 : vector<128x1xf32> to vector<128x128xf32>
    %18 = vector.broadcast %16 : vector<1x128xf32> to vector<128x128xf32>
    %19 = arith.subf %17, %18 : vector<128x128xf32>
    %20 = arith.mulf %9, %9 : vector<128x128xf32>
    %21 = arith.mulf %14, %14 : vector<128x128xf32>
    %22 = arith.addf %20, %21 : vector<128x128xf32>
    %23 = arith.mulf %19, %19 : vector<128x128xf32>
    %24 = arith.addf %22, %23 : vector<128x128xf32>
    %c0_4 = arith.constant 0 : index
    %c0_5 = arith.constant 0 : index
    %25 = vector.load %arg5[%c0_4, %c0_5] : memref<128x1xi32, #tpu.memory_space<vmem>>, vector<128x1xi32>
    %c0_6 = arith.constant 0 : index
    %c0_7 = arith.constant 0 : index
    %26 = vector.load %arg6[%c0_6, %c0_7] : memref<1x128xi32, #tpu.memory_space<vmem>>, vector<1x128xi32>
    %27 = vector.broadcast %25 : vector<128x1xi32> to vector<128x128xi32>
    %28 = vector.broadcast %26 : vector<1x128xi32> to vector<128x128xi32>
    %29 = arith.cmpi eq, %27, %28 : vector<128x128xi32>
    %cst = arith.constant 4.000000e+00 : f32
    %30 = vector.broadcast %cst : f32 to vector<128x128xf32>
    %31 = arith.cmpf ole, %24, %30 : vector<128x128xf32>
    %32 = arith.andi %29, %31 : vector<128x128xi1>
    %33 = arith.extui %32 : vector<128x128xi1> to vector<128x128xi32>
    %34 = arith.sitofp %33 : vector<128x128xi32> to vector<128x128xf32>
    %35 = arith.truncf %34 : vector<128x128xf32> to vector<128x128xbf16>
    %c0_8 = arith.constant 0 : index
    %c0_9 = arith.constant 0 : index
    %36 = vector.load %arg8[%c0_8, %c0_9] : memref<1x128xf32, #tpu.memory_space<vmem>>, vector<1x128xf32>
    %c0_10 = arith.constant 0 : index
    %c0_11 = arith.constant 0 : index
    %37 = vector.load %arg2[%c0_10, %c0_11] : memref<128x128xbf16, #tpu.memory_space<vmem>>, vector<128x128xbf16>
    %cst_12 = arith.constant dense<0.000000e+00> : vector<128x128xf32>
    %38 = tpu.matmul %37, %35, %cst_12 {dimension_numbers = #tpu.dot_dimension_numbers<[1], [0], [0], [1], [0, 0, 1, 1], [], []>} : vector<128x128xbf16>, vector<128x128xbf16>, vector<128x128xf32> -> vector<128x128xf32>
    %39 = vector.broadcast %36 : vector<1x128xf32> to vector<128x128xf32>
    %40 = arith.addf %39, %38 : vector<128x128xf32>
    %cst_13 = arith.constant 3.200000e+01 : f32
    %41 = vector.broadcast %cst_13 : f32 to vector<128x128xf32>
    %42 = arith.cmpf ole, %40, %41 : vector<128x128xf32>
    %43 = arith.andi %32, %42 : vector<128x128xi1>
    %44 = vector.extract_strided_slice %40 {offsets = [127, 0], sizes = [1, 128], strides = [1, 1]} : vector<128x128xf32> to vector<1x128xf32>
    %c0_14 = arith.constant 0 : index
    %c0_15 = arith.constant 0 : index
    %45 = vector.load %arg8[%c0_14, %c0_15] : memref<1x128xf32, #tpu.memory_space<vmem>>, vector<1x128xf32>
    tpu.vector_store %arg8[%c0_14, %c0_15], %44 {strides = array<i32>} : memref<1x128xf32, #tpu.memory_space<vmem>>, vector<1x128xf32>,
    %46 = arith.extui %43 : vector<128x128xi1> to vector<128x128xi8>
    %c0_16 = arith.constant 0 : index
    %c0_17 = arith.constant 0 : index
    %47 = vector.load %arg7[%c0_16, %c0_17] : memref<128x128xi8, #tpu.memory_space<vmem>>, vector<128x128xi8>
    tpu.vector_store %arg7[%c0_16, %c0_17], %46 {strides = array<i32>} : memref<128x128xi8, #tpu.memory_space<vmem>>, vector<128x128xi8>,
    return
  }
  func.func @transform_0(%arg0: i32, %arg1: i32) -> (i32, i32) {
    %c0_i32 = arith.constant 0 : i32
    %c0_i32_0 = arith.constant 0 : i32
    %c0_i32_1 = arith.constant 0 : i32
    return %c0_i32, %c0_i32_0 : i32, i32
  }
  func.func @transform_1(%arg0: i32, %arg1: i32) -> (i32, i32) {
    %c0_i32 = arith.constant 0 : i32
    %c0_i32_0 = arith.constant 0 : i32
    return %arg1, %c0_i32 : i32, i32
  }
  func.func @transform_2(%arg0: i32, %arg1: i32) -> (i32, i32) {
    %c0_i32 = arith.constant 0 : i32
    %c0_i32_0 = arith.constant 0 : i32
    return %c0_i32, %arg0 : i32, i32
  }
  func.func @transform_3(%arg0: i32, %arg1: i32) -> (i32, i32) {
    %c0_i32 = arith.constant 0 : i32
    %c0_i32_0 = arith.constant 0 : i32
    return %arg1, %c0_i32 : i32, i32
  }
  func.func @transform_4(%arg0: i32, %arg1: i32) -> (i32, i32) {
    %c0_i32 = arith.constant 0 : i32
    %c0_i32_0 = arith.constant 0 : i32
    return %c0_i32, %arg0 : i32, i32
  }
  func.func @transform_5(%arg0: i32, %arg1: i32) -> (i32, i32) {
    %c0_i32 = arith.constant 0 : i32
    return %arg1, %arg0 : i32, i32
  }
}

</mosaic_0001>

<bundles_post_ra>
// kernel: tpu_custom_call.1
= control target key start
LH: loop header
LB: loop body
LE: loop exit
PB: predicated region body
PF: predicated region fallthrough
CT: control target
= control target key end

     0   :  { %v982_v1 = vmov 2   ;;  %v983_v2 = vmov 1   ;;  %v984_v7 = vmov 0   ;;  %s1602_s0 = inlined_call_operand.vmem [shape: bf16[128,128], index: 0, kind: input, shape index: {}]   ;;  %s1603_s1 = inlined_call_operand.vmem [shape: f32[128,3], index: 1, kind: input, shape index: {}]   ;;  %s1604_s2 = inlined_call_operand.vmem [shape: f32[3,128], index: 2, kind: input, shape index: {}]   ;;  %s1605_s3 = inlined_call_operand.vmem [shape: s32[128,1], index: 3, kind: input, shape index: {}]   ;;  %s1606_s4 = inlined_call_operand.vmem [shape: s32[1,128], index: 4, kind: input, shape index: {}]   ;;  %s1607_s5 = inlined_call_operand.hbm [shape: s8[128,128], index: 5, kind: output, shape index: {}]  }
   0x1   :  { %v29_v0 = vld [vmem:[%s1603_s1] sm:$0xff]  ;;  %919 = vset.pattern.permute.xlu0 %v982_v1  ;;  %918 = vset.pattern.permute.xlu1 %v983_v2  ;;  %v31_v3 = vld [vmem:[%s1603_s1 + $0x10] sm:$0xff]  ;;  %v30_v4 = vld [vmem:[%s1603_s1 + $0x8] sm:$0xff] }
   0x2   :  { %231 = vperm.xlu0 %919, %v29_v0   ;;  %147 = vperm.xlu1 %918, %v29_v0   ;;  %v33_v5 = vld [vmem:[%s1603_s1 + $0x20] sm:$0xff]  ;;  %v35_v6 = vld [vmem:[%s1603_s1 + $0x30] sm:$0xff] }
   0x3   :  { %v1042_v8 = vld [vmem:[%s1603_s1 + $0x40] sm:$0xff] }
   0x6   :  { %239 = vperm.xlu0 %919, %v31_v3   ;;  %151 = vperm.xlu1 %918, %v30_v4  }
   0xa   :  { %247 = vperm.xlu0 %919, %v33_v5   ;;  %920 = vset.pattern.permute.xlu1 %v982_v1 }
   0xb   :  { %235 = vperm.xlu1 %920, %v30_v4  }
   0xe   :  { %255 = vperm.xlu0 %919, %v35_v6  }
   0xf   :  { %921 = vset.pattern.permute.xlu1 %v984_v7 }
  0x10   :  { %10 = vsyncpa [#allocation4], 0  ;;  %58 = vperm.xlu1 %921, %v31_v3   ;;  %v1048_v9 = vld [vmem:[%s1603_s1 + $0x50] sm:$0xff]  ;;  %v32_v10 = vld [vmem:[%s1603_s1 + $0x18] sm:$0xff]  ;;  %v126_v41 = vlaneseq }
  0x11   :  { %v1058_v11 = vld [vmem:[%s1603_s1 + $0x60] sm:$0xff]  ;;  %v1064_v12 = vld [vmem:[%s1603_s1 + $0x70] sm:$0xff]  ;;  %v34_v13 = vld [vmem:[%s1603_s1 + $0x28] sm:$0xff] }
  0x12   :  { %263 = vperm.xlu0 %919, %v1042_v8   ;;  %v395_v14 = vld [vmem:[%s1605_s3 + $0x8] sm:$0xff]  ;;  %v394_v15 = vld [vmem:[%s1605_s3] sm:$0xff]  ;;  %v36_v16 = vld [vmem:[%s1603_s1 + $0x38] sm:$0xff]  ;;  %v127_v44 = vshrl.u32 %v126_v41, 7 }
  0x13   :  { %v396_v17 = vld [vmem:[%s1605_s3 + $0x10] sm:$0xff]  ;;  %v38_v18 = vld [vmem:[%s1603_s1 + $0x48] sm:$0xff]  ;;  %v398_v19 = vld [vmem:[%s1605_s3 + $0x20] sm:$0xff] }
  0x14   :  { %922 = vset.pattern.permute.xlu1 %v983_v2  ;;  %v40_v20 = vld [vmem:[%s1603_s1 + $0x58] sm:$0xff]  ;;  %v400_v22 = vld [vmem:[%s1605_s3 + $0x30] sm:$0xff]  ;;  %v42_v23 = vld [vmem:[%s1603_s1 + $0x68] sm:$0xff]  ;;  %v212_v46 = vsub.s32 1, %v127_v44  ;;  %v128_v47 = vsub.s32 0, %v127_v44  ;;  %v296_v51 = vsub.s32 2, %v127_v44 }
  0x15   :  { %155 = vperm.xlu1 %922, %v31_v3   ;;  %v397_v21 = vld [vmem:[%s1605_s3 + $0x18] sm:$0xff]  ;;  %v402_v24 = vld [vmem:[%s1605_s3 + $0x40] sm:$0xff]  ;;  %v404_v26 = vld [vmem:[%s1605_s3 + $0x50] sm:$0xff] }
  0x16   :  { %271 = vperm.xlu0 %919, %v1048_v9   ;;  %v1118_v25 = vld [vmem:[%s1603_s1 + $0x78] sm:$0xff]  ;;  %v407_v27 = vld [vmem:[%s1605_s3 + $0x68] sm:$0xff]  ;;  %v45_v50 = vld [vmem:[%s1604_s2] sm:$0x7] }
  0x17   :  { %v399_v28 = vld [vmem:[%s1605_s3 + $0x28] sm:$0xff]  ;;  %v401_v29 = vld [vmem:[%s1605_s3 + $0x38] sm:$0xff]  ;;  %v1181_v52 = vrot.slane %v45_v50, %v212_v46  ;;  %v1183_v53 = vrot.slane %v45_v50, %v128_v47  ;;  %v1188_v57 = vrot.slane %v45_v50, %v296_v51 }
  0x18   :  { %v403_v37 = vld [vmem:[%s1605_s3 + $0x48] sm:$0xff]  ;;  %v405_v61 = vld [vmem:[%s1605_s3 + $0x58] sm:$0xff] }
  0x19   :  { %159 = vperm.xlu1 %922, %v32_v10  }
  0x1a   :  { %279 = vperm.xlu0 %919, %v1058_v11  }
  0x1d   :  { %923 = vset.pattern.permute.xlu1 %v982_v1 }
  0x1e   :  { %287 = vperm.xlu0 %919, %v1064_v12   ;;  %243 = vperm.xlu1 %923, %v32_v10  }
  0x22   :  { %947 = vset.pattern.permute.xlu0 %v984_v7  ;;  %924 = vset.pattern.permute.xlu1 %v984_v7 }
  0x23   :  { %48 = vperm.xlu0 %947, %v29_v0   ;;  %68 = vperm.xlu1 %924, %v33_v5  }
  0x27   :  { %53 = vperm.xlu0 %947, %v30_v4   ;;  %925 = vset.pattern.permute.xlu1 %v983_v2 }
  0x28   :  { %163 = vperm.xlu1 %925, %v33_v5  }
  0x2b   :  { %63 = vperm.xlu0 %947, %v32_v10  }
  0x2c   :  { %167 = vperm.xlu1 %925, %v34_v13  }
  0x2f   :  { %73 = vperm.xlu0 %947, %v34_v13  }
  0x30   :  { %926 = vset.pattern.permute.xlu1 %v984_v7 }
  0x31   :  { %415 = vperm.xlu1 %926, %v395_v14  }
  0x33   :  { %412 = vperm.xlu0 %947, %v394_v15  }
  0x35   :  { %927 = vset.pattern.permute.xlu1 %v982_v1 }
  0x36   :  { %251 = vperm.xlu1 %927, %v34_v13  }
  0x37   :  { %83 = vperm.xlu0 %947, %v36_v16  }
  0x3a   :  { %928 = vset.pattern.permute.xlu1 %v984_v7 }
  0x3b   :  { %418 = vperm.xlu0 %947, %v396_v17   ;;  %78 = vperm.xlu1 %928, %v35_v6  }
  0x3f   :  { %93 = vperm.xlu0 %947, %v38_v18   ;;  %929 = vset.pattern.permute.xlu1 %v983_v2 }
  0x40   :  { %171 = vperm.xlu1 %929, %v35_v6  }
  0x43   :  { %424 = vperm.xlu0 %947, %v398_v19   ;;  %v406_v19 = vld [vmem:[%s1605_s3 + $0x60] sm:$0xff] }
  0x44   :  { %175 = vperm.xlu1 %929, %v36_v16  }
  0x47   :  { %103 = vperm.xlu0 %947, %v40_v20  }
  0x48   :  { %930 = vset.pattern.permute.xlu1 %v984_v7 }
  0x49   :  { %421 = vperm.xlu1 %930, %v397_v21  }
  0x4b   :  { %430 = vperm.xlu0 %947, %v400_v22   ;;  %v408_v22 = vld [vmem:[%s1605_s3 + $0x70] sm:$0xff] }
  0x4d   :  { %931 = vset.pattern.permute.xlu1 %v982_v1 }
  0x4e   :  { %259 = vperm.xlu1 %931, %v36_v16   ;;  %v1211_v16 = vld [vmem:[%s1606_s4] ss:$0 sm:$0xff] }
  0x4f   :  { %113 = vperm.xlu0 %947, %v42_v23  }
  0x52   :  { %932 = vset.pattern.permute.xlu1 %v984_v7 }
  0x53   :  { %88 = vperm.xlu1 %932, %v1042_v8   ;;  %436 = vperm.xlu0 %947, %v402_v24   ;;  %v985_v24 = vmov 1.0|1.0  }
  0x57   :  { %933 = vset.pattern.permute.xlu1 %v983_v2  ;;  %123 = vperm.xlu0 %947, %v1118_v25  }
  0x58   :  { %179 = vperm.xlu1 %933, %v1042_v8  }
  0x5b   :  { %442 = vperm.xlu0 %947, %v404_v26   ;;  %v409_v26 = vld [vmem:[%s1605_s3 + $0x78] sm:$0xff] }
  0x5c   :  { %183 = vperm.xlu1 %933, %v38_v18  }
  0x5f   :  { %451 = vperm.xlu0 %947, %v407_v27  }
  0x60   :  { %934 = vset.pattern.permute.xlu1 %v984_v7 }
  0x61   :  { %427 = vperm.xlu1 %934, %v399_v28  }
  0x65   :  { %935 = vset.pattern.permute.xlu1 %v982_v1 }
  0x66   :  { %267 = vperm.xlu1 %935, %v38_v18  }
  0x6a   :  { %936 = vset.pattern.permute.xlu1 %v984_v7 }
  0x6b   :  { %98 = vperm.xlu1 %936, %v1048_v9  }
  0x6f   :  { %937 = vset.pattern.permute.xlu1 %v983_v2 }
  0x70   :  { %187 = vperm.xlu1 %937, %v1048_v9  }
  0x74   :  { %191 = vperm.xlu1 %937, %v40_v20  }
  0x78   :  { %938 = vset.pattern.permute.xlu1 %v984_v7 }
  0x79   :  { %433 = vperm.xlu1 %938, %v401_v29  }
  0x7d   :  { %939 = vset.pattern.permute.xlu1 %v982_v1 }
  0x7e   :  { %275 = vperm.xlu1 %939, %v40_v20  }
  0x81   :  { %v148_v30 = vpop.permute.xlu1 %147  ;;  %v232_v31 = vpop.permute.xlu0 %231 }
  0x82   :  { %940 = vset.pattern.permute.xlu1 %v984_v7  ;;  %v214_v58 = vsub.f32 %v148_v30, %v1181_v52  ;;  %v298_v62 = vsub.f32 %v232_v31, %v1188_v57 }
  0x83   :  { %108 = vperm.xlu1 %940, %v1058_v11  }
  0x84   :  { %v330_v4 = vmul.f32 %v214_v58, %v214_v58  ;;  %v362_v9 = vmul.f32 %v298_v62, %v298_v62  ;;  %v986_v62 = vmov 0.0  }
  0x85   :  { %v152_v32 = vpop.permute.xlu1 %151  ;;  %v1145_v33 = vpop.permute.xlu0 %239  ;;  %28 = vst [vmem:[#allocation2] sm:$0x1] %v986_v62  ;;  %v1630_v62 = vmov 0 }
  0x86   :  { %v215_v59 = vsub.f32 %v152_v32, %v1181_v52  ;;  %v300_v31 = vsub.f32 %v1145_v33, %v1188_v57 }
  0x87   :  { %941 = vset.pattern.permute.xlu1 %v983_v2 }
  0x88   :  { %195 = vperm.xlu1 %941, %v1058_v11   ;;  %v331_v5 = vmul.f32 %v215_v59, %v215_v59  ;;  %v364_v47 = vmul.f32 %v300_v31, %v300_v31 }
  0x89   :  { %v1149_v34 = vpop.permute.xlu0 %247 }
  0x8a   :  { %v236_v35 = vpop.permute.xlu1 %235 }
  0x8b   :  { %v299_v3 = vsub.f32 %v236_v35, %v1188_v57 }
  0x8c   :  { %199 = vperm.xlu1 %941, %v42_v23  }
  0x8d   :  { %v1151_v36 = vpop.permute.xlu0 %255  ;;  %v363_v13 = vmul.f32 %v299_v3, %v299_v3 }
  0x8f   :  { %v1156_v38 = vpop.permute.xlu1 %58 }
  0x90   :  { %942 = vset.pattern.permute.xlu1 %v984_v7  ;;  %v132_v28 = vsub.f32 %v1156_v38, %v1183_v53  ;;  %v950_v38 = vld [vmem:[%s1602_s0] sm:$0xff]  }
  0x91   :  { %439 = vperm.xlu1 %942, %v403_v37   ;;  %v1159_v39 = vpop.permute.xlu0 %263  ;;  %878 = vmatprep.mubr.bf16.mxu0 %v950_v38 }
  0x94   :  { %v1161_v40 = vpop.permute.xlu1 %155 }
  0x95   :  { %943 = vset.pattern.permute.xlu1 %v982_v1  ;;  %v1164_v42 = vpop.permute.xlu0 %271 }
  0x96   :  { %283 = vperm.xlu1 %943, %v42_v23  }
  0x98   :  { %v1166_v43 = vpop.permute.xlu1 %159 }
  0x99   :  { %v1168_v45 = vpop.permute.xlu0 %279  ;;  %v217_v30 = vsub.f32 %v1166_v43, %v1181_v52  ;;  %v951_v43 = vld [vmem:[%s1602_s0 + $0x20] sm:$0xff]  }
  0x9a   :  { %944 = vset.pattern.permute.xlu1 %v984_v7  ;;  %886 = vmatprep.mubr.bf16.mxu1 %v951_v43 }
  0x9b   :  { %118 = vperm.xlu1 %944, %v1064_v12   ;;  %v333_v41 = vmul.f32 %v217_v30, %v217_v30 }
  0x9d   :  { %v1172_v48 = vpop.permute.xlu1 %243  ;;  %v1174_v49 = vpop.permute.xlu0 %287 }
  0x9e   :  { %v301_v44 = vsub.f32 %v1172_v48, %v1188_v57 }
  0x9f   :  { %945 = vset.pattern.permute.xlu1 %v983_v2 }
  0xa0   :  { %203 = vperm.xlu1 %945, %v1064_v12   ;;  %v365_v51 = vmul.f32 %v301_v44, %v301_v44 }
  0xa2   :  { %v49_v54 = vpop.permute.xlu0 %48  ;;  %v1185_v55 = vpop.permute.xlu1 %68 }
  0xa3   :  { %v130_v56 = vsub.f32 %v49_v54, %v1183_v53  ;;  %v134_v3 = vsub.f32 %v1185_v55, %v1183_v53 }
  0xa4   :  { %207 = vperm.xlu1 %945, %v1118_v25  }
  0xa5   :  { %v314_v63 = vmul.f32 %v130_v56, %v130_v56 }
  0xa6   :  { %v54_v60 = vpop.permute.xlu0 %53 }
  0xa7   :  { %v131_v0 = vsub.f32 %v54_v60, %v1183_v53  ;;  %v1198_v2 = vpop.permute.xlu1 %163  ;;  %v346_v10 = vadd.f32 %v330_v4, %v314_v63 }
  0xa8   :  { %946 = vset.pattern.permute.xlu1 %v984_v7 }
  0xa9   :  { %v315_v6 = vmul.f32 %v131_v0, %v131_v0  ;;  %445 = vperm.xlu1 %946, %v405_v61   ;;  %v378_v17 = vadd.f32 %v362_v9, %v346_v10  ;;  %v218_v0 = vsub.f32 %v1198_v2, %v1181_v52  ;;  %v318_v2 = vmul.f32 %v134_v3, %v134_v3 }
  0xaa   :  { %v64_v8 = vpop.permute.xlu0 %63 }
  0xab   :  { %v347_v11 = vadd.f32 %v331_v5, %v315_v6  ;;  %v1202_v12 = vpop.permute.xlu1 %167  ;;  %vm479_vm4 = vcmp.le.f32.partialorder %v378_v17, 4.0  ;;  %v133_v27 = vsub.f32 %v64_v8, %v1183_v53  ;;  %v302_v6 = vsub.f32 %v1149_v34, %v1188_v57 }
  0xac   :  { %v334_v8 = vmul.f32 %v218_v0, %v218_v0  ;;  %v219_v9 = vsub.f32 %v1202_v12, %v1181_v52 }
  0xad   :  { %948 = vset.pattern.permute.xlu1 %v982_v1  ;;  %v379_v15 = vadd.f32 %v363_v13, %v347_v11  ;;  %v317_v35 = vmul.f32 %v133_v27, %v133_v27  ;;  %v366_v55 = vmul.f32 %v302_v6, %v302_v6 }
  0xae   :  { %v1205_v14 = vpop.permute.xlu0 %73  ;;  %291 = vperm.xlu1 %948, %v1118_v25   ;;  %v216_v25 = vsub.f32 %v1161_v40, %v1181_v52  ;;  %v316_v40 = vmul.f32 %v132_v28, %v132_v28  ;;  %v350_v17 = vadd.f32 %v334_v8, %v318_v2 }
  0xaf   :  { %vm480_vm1 = vcmp.le.f32.partialorder %v379_v15, 4.0  ;;  %v349_v50 = vadd.f32 %v333_v41, %v317_v35  ;;  %v135_v5 = vsub.f32 %v1205_v14, %v1183_v53 }
  0xb0   :  { %v416_v18 = vpop.permute.xlu1 %415  ;;  %v332_v32 = vmul.f32 %v216_v25, %v216_v25  ;;  %v382_v25 = vadd.f32 %v366_v55, %v350_v17 }
  0xb1   :  { %vm464_vm0 = vcmp.eq.s32.totalorder %v416_v18, %v1211_v16  ;;  %v381_v59 = vadd.f32 %v365_v51, %v349_v50  ;;  %v319_v13 = vmul.f32 %v135_v5, %v135_v5  ;;  %v335_v18 = vmul.f32 %v219_v9, %v219_v9 }
  0xb2   :  { %v413_v1 = vpop.permute.xlu0 %412  ;;  %949 = vset.pattern.permute.xlu1 %v984_v7  ;;  %vm1218_vm2 = vmand %vm464_vm0, %vm480_vm1  ;;  %v348_v33 = vadd.f32 %v332_v32, %v316_v40  ;;  %vm483_vm15 = vcmp.le.f32.partialorder %v382_v25, 4.0  ;;  %v304_v40 = vsub.f32 %v1151_v36, %v1188_v57  ;;  %v306_v5 = vsub.f32 %v1159_v39, %v1188_v57 }
  0xb3   :  { %vm463_vm3 = vcmp.eq.s32.totalorder %v413_v1, %v1211_v16  ;;  %448 = vperm.xlu1 %949, %v406_v19   ;;  %vm482_vm10 = vcmp.le.f32.partialorder %v381_v59, 4.0  ;;  %v351_v1 = vadd.f32 %v335_v18, %v319_v13 }
  0xb4   :  { %vm1223_vm5 = vmand %vm463_vm3, %vm479_vm4  ;;  %v380_v58 = vadd.f32 %v364_v47, %v348_v33  ;;  %v370_v17 = vmul.f32 %v306_v5, %v306_v5 }
  0xb5   :  { %vm829_vm6 = vmpackc.low %vm1218_vm2, %vm1223_vm5  ;;  %v252_v23 = vpop.permute.xlu1 %251 }
  0xb6   :  { %862 = vmatprep.subr.msk.bf16.mxu0 %vm829_vm6, %v985_v24  ;;  %894 = vmatprep.subr.msk.bf16.mxu1 %vm829_vm6, %v985_v24  ;;  %v1252_v37 = vpop.permute.xlu0 %83  ;;  %vm481_vm8 = vcmp.le.f32.partialorder %v380_v58, 4.0  ;;  %v303_v10 = vsub.f32 %v252_v23, %v1188_v57  ;;  %v1624_v23 = vmov 0 }
  0xb7   :  { %454 = vperm.xlu1 %949, %v408_v22   ;;  %863 = vmatpush3.bf16.msk.msra.mxu0 %vm829_vm6, %v985_v24  ;;  %v137_v32 = vsub.f32 %v1252_v37, %v1183_v53 }
  0xb8   :  { %902 = vmatpush3.bf16.msk.msra.mxu1 %vm829_vm6, %v985_v24  ;;  %v367_v19 = vmul.f32 %v303_v10, %v303_v10 }
  0xba   :  { %v1246_v29 = vpop.permute.xlu1 %78  ;;  %v419_v54 = vpop.permute.xlu0 %418  ;;  %v383_v34 = vadd.f32 %v367_v19, %v351_v1 }
  0xbb   :  { %457 = vperm.xlu1 %949, %v409_v26   ;;  %vm465_vm7 = vcmp.eq.s32.totalorder %v419_v54, %v1211_v16  ;;  %v1626_v26 = vmov 0  ;;  %v136_v30 = vsub.f32 %v1246_v29, %v1183_v53  ;;  %v368_v29 = vmul.f32 %v304_v40, %v304_v40 }
  0xbc   :  { %vm1263_vm9 = vmand %vm465_vm7, %vm481_vm8  ;;  %vm484_vm1 = vcmp.le.f32.partialorder %v383_v34, 4.0 }
  0xbd   :  { %v320_v43 = vmul.f32 %v136_v30, %v136_v30 }
  0xbe   :  { %v1293_v11 = vpop.permute.xlu0 %93 }
  0xbf   :  { %v172_v46 = vpop.permute.xlu1 %171  ;;  %v139_v9 = vsub.f32 %v1293_v11, %v1183_v53 }
  0xc0   :  { %v220_v28 = vsub.f32 %v172_v46, %v1181_v52  ;;  %v321_v46 = vmul.f32 %v137_v32, %v137_v32 }
  0xc2   :  { %v425_v14 = vpop.permute.xlu0 %424  ;;  %v336_v41 = vmul.f32 %v220_v28, %v220_v28 }
  0xc3   :  { %v176_v56 = vpop.permute.xlu1 %175  ;;  %vm467_vm14 = vcmp.eq.s32.totalorder %v425_v14, %v1211_v16 }
  0xc4   :  { %vm1296_vm0 = vmand %vm467_vm14, %vm483_vm15  ;;  %v221_v35 = vsub.f32 %v176_v56, %v1181_v52  ;;  %v352_v50 = vadd.f32 %v336_v41, %v320_v43  ;;  %v308_v43 = vsub.f32 %v1164_v42, %v1188_v57 }
  0xc5   :  { %v1625_v23 = vsel %vm1296_vm0, 4294967295, %v1624_v23 }
  0xc6   :  { %v1323_v44 = vpop.permute.xlu0 %103  ;;  %v337_v47 = vmul.f32 %v221_v35, %v221_v35  ;;  %v384_v59 = vadd.f32 %v368_v29, %v352_v50 }
  0xc7   :  { %v141_v41 = vsub.f32 %v1323_v44, %v1183_v53 }
  0xc8   :  { %v422_v48 = vpop.permute.xlu1 %421  ;;  %v353_v54 = vadd.f32 %v337_v47, %v321_v46  ;;  %vm485_vm8 = vcmp.le.f32.partialorder %v384_v59, 4.0 }
  0xc9   :  { %vm466_vm11 = vcmp.eq.s32.totalorder %v422_v48, %v1211_v16  ;;  %v1628_v48 = vmov 0 }
  0xca   :  { %vm1268_vm12 = vmand %vm466_vm11, %vm482_vm10  ;;  %v431_v58 = vpop.permute.xlu0 %430 }
  0xcb   :  { %vm831_vm13 = vmpackc.low %vm1268_vm12, %vm1263_vm9  ;;  %vm469_vm7 = vcmp.eq.s32.totalorder %v431_v58, %v1211_v16  ;;  %v372_v58 = vmul.f32 %v308_v43, %v308_v43 }
  0xcc   :  { %864 = vmatprep.subr.msk.bf16.mxu0 %vm831_vm13, %v985_v24  ;;  %895 = vmatprep.subr.msk.bf16.mxu1 %vm831_vm13, %v985_v24  ;;  %vm1327_vm10 = vmand %vm469_vm7, %vm485_vm8 }
  0xcd   :  { %865 = vmatpush3.bf16.msk.msra.mxu0 %vm831_vm13, %v985_v24  ;;  %903 = vmatpush3.bf16.msk.msra.mxu1 %vm831_vm13, %v985_v24  ;;  %v260_v63 = vpop.permute.xlu1 %259  ;;  %v1629_v48 = vsel %vm1327_vm10, 4294967295, %v1628_v48 }
  0xce   :  { %v305_v38 = vsub.f32 %v260_v63, %v1188_v57  ;;  %v114_v13 = vpop.permute.xlu0 %113 }
  0xcf   :  { %v143_v42 = vsub.f32 %v114_v13, %v1183_v53 }
  0xd0   :  { %v369_v51 = vmul.f32 %v305_v38, %v305_v38 }
  0xd2   :  { %v1284_v4 = vpop.permute.xlu1 %88  ;;  %v385_v56 = vadd.f32 %v369_v51, %v353_v54  ;;  %v437_v39 = vpop.permute.xlu0 %436  ;;  %v325_v51 = vmul.f32 %v141_v41, %v141_v41 }
  0xd3   :  { %v138_v3 = vsub.f32 %v1284_v4, %v1183_v53 }
  0xd4   :  { %vm486_vm11 = vcmp.le.f32.partialorder %v385_v56, 4.0 }
  0xd5   :  { %v322_v2 = vmul.f32 %v138_v3, %v138_v3 }
  0xd6   :  { %v124_v47 = vpop.permute.xlu0 %123 }
  0xd7   :  { %v180_v15 = vpop.permute.xlu1 %179 }
  0xd8   :  { %v222_v0 = vsub.f32 %v180_v15, %v1181_v52  ;;  %v323_v15 = vmul.f32 %v139_v9, %v139_v9 }
  0xda   :  { %v338_v6 = vmul.f32 %v222_v0, %v222_v0  ;;  %v443_v44 = vpop.permute.xlu0 %442 }
  0xdb   :  { %v184_v22 = vpop.permute.xlu1 %183 }
  0xdc   :  { %v223_v10 = vsub.f32 %v184_v22, %v1181_v52  ;;  %v354_v18 = vadd.f32 %v338_v6, %v322_v2 }
  0xde   :  { %v339_v19 = vmul.f32 %v223_v10, %v223_v10  ;;  %v386_v14 = vadd.f32 %v370_v17, %v354_v18  ;;  %v327_v10 = vmul.f32 %v143_v42, %v143_v42  ;;  %v310_v17 = vsub.f32 %v1168_v45, %v1188_v57 }
  0xe0   :  { %v428_v12 = vpop.permute.xlu1 %427  ;;  %v355_v25 = vadd.f32 %v339_v19, %v323_v15 }
  0xe1   :  { %vm468_vm3 = vcmp.eq.s32.totalorder %v428_v12, %v1211_v16 }
  0xe2   :  { %vm1301_vm4 = vmand %vm468_vm3, %vm484_vm1  ;;  %vm471_vm1 = vcmp.eq.s32.totalorder %v437_v39, %v1211_v16  ;;  %vm487_vm3 = vcmp.le.f32.partialorder %v386_v14, 4.0  ;;  %v374_v14 = vmul.f32 %v310_v17, %v310_v17 }
  0xe3   :  { %v1627_v26 = vsel %vm1301_vm4, 4294967295, %v1626_v26  ;;  %vm833_vm6 = vmpackc.low %vm1301_vm4, %vm1296_vm0 }
  0xe4   :  { %866 = vmatprep.subr.msk.bf16.mxu0 %vm833_vm6, %v985_v24  ;;  %896 = vmatprep.subr.msk.bf16.mxu1 %vm833_vm6, %v985_v24 }
  0xe5   :  { %867 = vmatpush3.bf16.msk.msra.mxu0 %vm833_vm6, %v985_v24  ;;  %904 = vmatpush3.bf16.msk.msra.mxu1 %vm833_vm6, %v985_v24  ;;  %v268_v27 = vpop.permute.xlu1 %267  ;;  %vm1354_vm6 = vmand %vm471_vm1, %vm487_vm3 }
  0xe6   :  { %v307_v55 = vsub.f32 %v268_v27, %v1188_v57 }
  0xe8   :  { %v371_v4 = vmul.f32 %v307_v55, %v307_v55 }
  0xea   :  { %v1316_v31 = vpop.permute.xlu1 %98  ;;  %v387_v12 = vadd.f32 %v371_v4, %v355_v25 }
  0xeb   :  { %v140_v32 = vsub.f32 %v1316_v31, %v1183_v53 }
  0xec   :  { %vm488_vm7 = vcmp.le.f32.partialorder %v387_v12, 4.0  ;;  %v145_v12 = vsub.f32 %v124_v47, %v1183_v53  ;;  %v1642_v47 = vmov 0 }
  0xed   :  { %v324_v46 = vmul.f32 %v140_v32, %v140_v32  ;;  %v312_v32 = vsub.f32 %v1174_v49, %v1188_v57 }
  0xef   :  { %v188_v33 = vpop.permute.xlu1 %187 }
  0xf0   :  { %v224_v30 = vsub.f32 %v188_v33, %v1181_v52 }
  0xf2   :  { %v340_v35 = vmul.f32 %v224_v30, %v224_v30 }
  0xf3   :  { %v192_v37 = vpop.permute.xlu1 %191 }
  0xf4   :  { %v225_v38 = vsub.f32 %v192_v37, %v1181_v52  ;;  %v356_v50 = vadd.f32 %v340_v35, %v324_v46  ;;  %v1640_v46 = vmov 0 }
  0xf6   :  { %v341_v33 = vmul.f32 %v225_v38, %v225_v38  ;;  %v388_v59 = vadd.f32 %v372_v58, %v356_v50  ;;  %v329_v38 = vmul.f32 %v145_v12, %v145_v12  ;;  %v952_v58 = vld [vmem:[%s1602_s0 + $0x8] sm:$0xff]  }
  0xf8   :  { %v434_v36 = vpop.permute.xlu1 %433  ;;  %vm489_vm1 = vcmp.le.f32.partialorder %v388_v59, 4.0  ;;  %v955_v59 = vld [vmem:[%s1602_s0 + $0x30] sm:$0xff]  }
  0xf9   :  { %vm470_vm13 = vcmp.eq.s32.totalorder %v434_v36, %v1211_v16  ;;  %v357_v36 = vadd.f32 %v341_v33, %v325_v51  ;;  %v1644_v33 = vmov 0 }
  0xfa   :  { %vm1332_vm14 = vmand %vm470_vm13, %vm486_vm11 }
  0xfb   :  { %v1631_v62 = vsel %vm1332_vm14, 4294967295, %v1630_v62  ;;  %vm835_vm15 = vmpackc.low %vm1332_vm14, %vm1327_vm10 }
  0xfc   :  { %868 = vmatprep.subr.msk.bf16.mxu0 %vm835_vm15, %v985_v24  ;;  %897 = vmatprep.subr.msk.bf16.mxu1 %vm835_vm15, %v985_v24 }
  0xfd   :  { %869 = vmatpush3.bf16.msk.msra.mxu0 %vm835_vm15, %v985_v24  ;;  %905 = vmatpush3.bf16.msk.msra.mxu1 %vm835_vm15, %v985_v24  ;;  %v276_v63 = vpop.permute.xlu1 %275  ;;  %vm473_vm15 = vcmp.eq.s32.totalorder %v443_v44, %v1211_v16 }
  0xfe   :  { %v309_v29 = vsub.f32 %v276_v63, %v1188_v57  ;;  %vm1388_vm3 = vmand %vm473_vm15, %vm489_vm1 }
 0x100   :  { %v373_v31 = vmul.f32 %v309_v29, %v309_v29 }
 0x102   :  { %v109_v8 = vpop.permute.xlu1 %108  ;;  %v389_v5 = vadd.f32 %v373_v31, %v357_v36  ;;  %v954_v31 = vld [vmem:[%s1602_s0 + $0x10] sm:$0xff]   ;;  %v1466_v36 = vld [vmem:[#allocation2] ss:$0 sm:$0xff] }
 0x103   :  { %v142_v63 = vsub.f32 %v109_v8, %v1183_v53 }
 0x105   :  { %v326_v13 = vmul.f32 %v142_v63, %v142_v63 }
 0x107   :  { %v196_v1 = vpop.permute.xlu1 %195 }
 0x108   :  { %v226_v37 = vsub.f32 %v196_v1, %v1181_v52 }
 0x10a   :  { %v342_v9 = vmul.f32 %v226_v37, %v226_v37 }
 0x10b   :  { %v200_v34 = vpop.permute.xlu1 %199 }
 0x10c   :  { %v227_v56 = vsub.f32 %v200_v34, %v1181_v52  ;;  %v358_v1 = vadd.f32 %v342_v9, %v326_v13 }
 0x10e   :  { %v343_v6 = vmul.f32 %v227_v56, %v227_v56  ;;  %v390_v30 = vadd.f32 %v374_v14, %v358_v1  ;;  %v956_v56 = vld [vmem:[%s1602_s0 + $0x18] sm:$0xff]  }
 0x110   :  { %v440_v11 = vpop.permute.xlu1 %439  ;;  %v359_v8 = vadd.f32 %v343_v6, %v327_v10 }
 0x111   :  { %vm472_vm8 = vcmp.eq.s32.totalorder %v440_v11, %v1211_v16  ;;  %v452_v11 = vpop.permute.xlu0 %451 }
 0x112   :  { %vm1359_vm11 = vmand %vm472_vm8, %vm488_vm7  ;;  %vm490_vm7 = vcmp.le.f32.partialorder %v389_v5, 4.0 }
 0x113   :  { %vm837_vm13 = vmpackc.low %vm1359_vm11, %vm1354_vm6 }
 0x114   :  { %870 = vmatprep.subr.msk.bf16.mxu0 %vm837_vm13, %v985_v24  ;;  %898 = vmatprep.subr.msk.bf16.mxu1 %vm837_vm13, %v985_v24 }
 0x115   :  { %871 = vmatpush3.bf16.msk.msra.mxu0 %vm837_vm13, %v985_v24  ;;  %906 = vmatpush3.bf16.msk.msra.mxu1 %vm837_vm13, %v985_v24  ;;  %v284_v28 = vpop.permute.xlu1 %283 }
 0x116   :  { %v311_v3 = vsub.f32 %v284_v28, %v1188_v57 }
 0x118   :  { %v375_v2 = vmul.f32 %v311_v3, %v311_v3 }
 0x11a   :  { %v119_v40 = vpop.permute.xlu1 %118  ;;  %v391_v45 = vadd.f32 %v375_v2, %v359_v8 }
 0x11b   :  { %v144_v4 = vsub.f32 %v119_v40, %v1183_v53  ;;  %v376_v53 = vmul.f32 %v312_v32, %v312_v32 }
 0x11c   :  { %vm492_vm1 = vcmp.le.f32.partialorder %v391_v45, 4.0 }
 0x11d   :  { %v328_v35 = vmul.f32 %v144_v4, %v144_v4 }
 0x11f   :  { %v204_v54 = vpop.permute.xlu1 %203 }
 0x120   :  { %v228_v15 = vsub.f32 %v204_v54, %v1181_v52  ;;  %v1646_v54 = vmov 0 }
 0x122   :  { %v344_v34 = vmul.f32 %v228_v15, %v228_v15 }
 0x123   :  { %v208_v0 = vpop.permute.xlu1 %207 }
 0x124   :  { %v229_v25 = vsub.f32 %v208_v0, %v1181_v52  ;;  %v360_v52 = vadd.f32 %v344_v34, %v328_v35 }
 0x126   :  { %v345_v40 = vmul.f32 %v229_v25, %v229_v25 }
 0x128   :  { %v446_v55 = vpop.permute.xlu1 %445  ;;  %v361_v49 = vadd.f32 %v345_v40, %v329_v38 }
 0x129   :  { %vm474_vm8 = vcmp.eq.s32.totalorder %v446_v55, %v1211_v16 }
 0x12a   :  { %vm1394_vm13 = vmand %vm474_vm8, %vm490_vm7  ;;  %vm476_vm7 = vcmp.eq.s32.totalorder %v452_v11, %v1211_v16  ;;  %vm491_vm8 = vcmp.le.f32.partialorder %v390_v30, 4.0 }
 0x12b   :  { %vm839_vm15 = vmpackc.low %vm1394_vm13, %vm1388_vm3 }
 0x12c   :  { %872 = vmatprep.subr.msk.bf16.mxu0 %vm839_vm15, %v985_v24  ;;  %899 = vmatprep.subr.msk.bf16.mxu1 %vm839_vm15, %v985_v24 }
 0x12d   :  { %873 = vmatpush3.bf16.msk.msra.mxu0 %vm839_vm15, %v985_v24  ;;  %907 = vmatpush3.bf16.msk.msra.mxu1 %vm839_vm15, %v985_v24  ;;  %v292_v39 = vpop.permute.xlu1 %291  ;;  %vm1413_vm15 = vmand %vm476_vm7, %vm492_vm1 }
 0x12e   :  { %v313_v28 = vsub.f32 %v292_v39, %v1188_v57  ;;  %v1641_v46 = vsel %vm1413_vm15, 4294967295, %v1640_v46  ;;  %v392_v57 = vadd.f32 %v376_v53, %v360_v52 }
 0x130   :  { %v377_v43 = vmul.f32 %v313_v28, %v313_v28  ;;  %vm493_vm1 = vcmp.le.f32.partialorder %v392_v57, 4.0 }
 0x132   :  { %v449_v41 = vpop.permute.xlu1 %448  ;;  %v393_v50 = vadd.f32 %v377_v43, %v361_v49 }
 0x133   :  { %vm475_vm4 = vcmp.eq.s32.totalorder %v449_v41, %v1211_v16 }
 0x134   :  { %vm1418_vm14 = vmand %vm475_vm4, %vm491_vm8  ;;  %vm494_vm8 = vcmp.le.f32.partialorder %v393_v50, 4.0 }
 0x135   :  { %v1643_v47 = vsel %vm1418_vm14, 4294967295, %v1642_v47  ;;  %vm841_vm0 = vmpackc.low %vm1413_vm15, %vm1418_vm14 }
 0x136   :  { %874 = vmatprep.subr.msk.bf16.mxu0 %vm841_vm0, %v985_v24  ;;  %900 = vmatprep.subr.msk.bf16.mxu1 %vm841_vm0, %v985_v24  ;;  %v455_v29 = vpop.permute.xlu1 %454 }
 0x137   :  { %875 = vmatpush3.bf16.msk.msra.mxu0 %vm841_vm0, %v985_v24  ;;  %908 = vmatpush3.bf16.msk.msra.mxu1 %vm841_vm0, %v985_v24  ;;  %vm477_vm4 = vcmp.eq.s32.totalorder %v455_v29, %v1211_v16 }
 0x138   :  { %vm1431_vm7 = vmand %vm477_vm4, %vm493_vm1 }
 0x139   :  { %v1645_v33 = vsel %vm1431_vm7, 4294967295, %v1644_v33 }
 0x13a   :  { %v458_v51 = vpop.permute.xlu1 %457 }
 0x13b   :  { %vm478_vm15 = vcmp.eq.s32.totalorder %v458_v51, %v1211_v16  ;;  %v953_v16 = vld [vmem:[%s1602_s0 + $0x28] sm:$0xff]  }
 0x13c   :  { %vm1436_vm14 = vmand %vm478_vm15, %vm494_vm8 }
 0x13d   :  { %v1647_v54 = vsel %vm1436_vm14, 4294967295, %v1646_v54  ;;  %vm843_vm0 = vmpackc.low %vm1436_vm14, %vm1431_vm7 }
 0x13e   :  { %876 = vmatprep.subr.msk.bf16.mxu0 %vm843_vm0, %v985_v24  ;;  %901 = vmatprep.subr.msk.bf16.mxu1 %vm843_vm0, %v985_v24 }
 0x13f   :  { %877 = vmatpush3.bf16.msk.msra.mxu0 %vm843_vm0, %v985_v24  ;;  %909 = vmatpush3.bf16.msk.msra.mxu1 %vm843_vm0, %v985_v24  ;;  %v957_v24 = vld [vmem:[%s1602_s0 + $0x38] sm:$0xff]   ;;  %s987_s0 = smov [#allocation3]  }
 0x140   :  { %s793_s22 = sshll.u32 %s987_s0, 4  ;;  %s794_s22 = int_to_ptr.vmem [resolvable:$true] %s793_s22 }
 0x141   :  { %s958_s23 = scalar_lea.vmem %s794_s22, 512  ;;  %p963_p1 = scmp.lt.s32.totalorder %s794_s22, %s794_s22 }
 0x142   :  { %879 = vmatmul.mubr.bf16.vlgmr.msra.gmra.mrb[0].mxu0 %v952_v58  ;;  %887 = vmatmul.mubr.bf16.vlgmr.msra.gmra.mrb[0].mxu1 %v953_v16  ;;  %p959_p0 = scmp.ne.s32.totalorder %s794_s22, %s958_s23  ;;  %p964_p2 = scmp.lt.s32.totalorder %s958_s23, %s958_s23 }
 0x143   :  { %882 = vmatprep.mubr.bf16.mxu0 %v954_v31  ;;  %890 = vmatprep.mubr.bf16.mxu1 %v955_v59 }
 0x144   :  { %p965_p3 = por %p964_p2, %p963_p1 }
 0x146   :  { %p966_p4 = pnand %p965_p3, %p959_p0 }
 0x14a   :  { %883 = vmatmul.mubr.bf16.gmra.mrb[4].mxu0 %v956_v56  ;;  %891 = vmatmul.mubr.bf16.gmra.mrb[4].mxu1 %v957_v24 }
 0x215   :  { %v880_v44 = vpop.f32.mrb[0].mxu0  ;;  %v888_v37 = vpop.f32.mrb[0].mxu1 }
 0x216   :  { %v721_v0 = vadd.f32 %v880_v44, %v1466_v36  ;;  %v729_v42 = vadd.f32 %v888_v37, %v1466_v36  ;;  %v650_v3 = vpop.f32.mrb[1].mxu0  ;;  %v682_v63 = vpop.f32.mrb[1].mxu1 }
 0x217   :  { %v719_v5 = vadd.f32 %v1466_v36, %v650_v3  ;;  %v727_v6 = vadd.f32 %v1466_v36, %v682_v63  ;;  %v881_v9 = vpop.f32.mrb[2].mxu0  ;;  %v889_v10 = vpop.f32.mrb[2].mxu1 }
 0x218   :  { %vm737_vm15 = vcmp.le.f32.partialorder %v721_v0, 32.0  ;;  %vm745_vm4 = vcmp.le.f32.partialorder %v729_v42, 32.0  ;;  %v722_v2 = vadd.f32 %v881_v9, %v1466_v36  ;;  %v730_v55 = vadd.f32 %v889_v10, %v1466_v36  ;;  %v653_v17 = vpop.f32.mrb[3].mxu0  ;;  %v685_v13 = vpop.f32.mrb[3].mxu1 }
 0x219   :  { %vm1476_vm1 = vmand %vm1263_vm9, %vm737_vm15  ;;  %vm735_vm8 = vcmp.le.f32.partialorder %v719_v5, 32.0  ;;  %vm743_vm0 = vcmp.le.f32.partialorder %v727_v6, 32.0  ;;  %v720_v1 = vadd.f32 %v1466_v36, %v653_v17  ;;  %v728_v4 = vadd.f32 %v1466_v36, %v685_v13 }
 0x21a   :  { %vm1482_vm14 = vmand %vm1388_vm3, %vm745_vm4  ;;  %vm738_vm7 = vcmp.le.f32.partialorder %v722_v2, 32.0  ;;  %vm746_vm15 = vcmp.le.f32.partialorder %v730_v55, 32.0 }
 0x21b   :  { %vm1489_vm10 = vmand %vm1223_vm5, %vm735_vm8 }
 0x21c   :  { %vm1495_vm9 = vmand %vm1354_vm6, %vm743_vm0  ;;  %vm736_vm6 = vcmp.le.f32.partialorder %v720_v1, 32.0 }
 0x21d   :  { %vm1501_vm3 = vmand %vm1268_vm12, %vm738_vm7  ;;  %v884_v21 = vpop.f32.mrb[4].mxu0  ;;  %v892_v14 = vpop.f32.mrb[4].mxu1 }
 0x21e   :  { %vm769_vm5 = vmpackc.low %vm1501_vm3, %vm1476_vm1  ;;  %v666_v22 = vpop.f32.mrb[5].mxu0  ;;  %v698_v25 = vpop.f32.mrb[5].mxu1  ;;  %v725_v12 = vadd.f32 %v884_v21, %v1466_v36  ;;  %v733_v19 = vadd.f32 %v892_v14, %v1466_v36 }
 0x21f   :  { %vm1512_vm4 = vmand %vm1394_vm13, %vm746_vm15  ;;  %v885_v39 = vpop.f32.mrb[6].mxu0  ;;  %v893_v34 = vpop.f32.mrb[6].mxu1  ;;  %vm744_vm13 = vcmp.le.f32.partialorder %v728_v4, 32.0  ;;  %v723_v32 = vadd.f32 %v1466_v36, %v666_v22  ;;  %v731_v35 = vadd.f32 %v1466_v36, %v698_v25 }
 0x220   :  { %vm775_vm12 = vmpackc.low %vm1512_vm4, %vm1482_vm14  ;;  %v734_v11 = vadd.f32 %v893_v34, %v1466_v36  ;;  %v669_v28 = vpop.f32.mrb[7].mxu0  ;;  %v701_v30 = vpop.f32.mrb[7].mxu1  ;;  %vm741_vm15 = vcmp.le.f32.partialorder %v725_v12, 32.0  ;;  %v726_v40 = vadd.f32 %v885_v39, %v1466_v36  ;;  %vm1666_vm14 = vnez %v1625_v23 }
 0x221   :  { %vm752_vm7 = vmand %vm1218_vm2, %vm736_vm6  ;;  %vm749_vm6 = vcmp.le.f32.partialorder %v733_v19, 32.0  ;;  %vm739_vm3 = vcmp.le.f32.partialorder %v723_v32, 32.0  ;;  %v724_v38 = vadd.f32 %v1466_v36, %v669_v28  ;;  %v732_v53 = vadd.f32 %v1466_v36, %v701_v30 }
 0x222   :  { %vm768_vm8 = vmpackc.low %vm752_vm7, %vm1489_vm10  ;;  %767 = vst [vmem:[#allocation2 - $0x7] sm:$0x80] %v734_v11  ;;  %vm747_vm7 = vcmp.le.f32.partialorder %v731_v35, 32.0 }
 0x223   :  { %vm770_vm0 = vmpackc.even %vm769_vm5, %vm768_vm8  ;;  %vm1660_vm5 = vnez %v1629_v48  ;;  %vm742_vm8 = vcmp.le.f32.partialorder %v726_v40, 32.0  ;;  %v1670_v48 = vmov 0 }
 0x224   :  { %v780_v20 = vsel %vm770_vm0, 16843009, %v984_v7  ;;  %vm760_vm2 = vmand %vm1359_vm11, %vm744_vm13 }
 0x225   :  { %784 = vst [vmem:[#allocation3] sm:$0xff] %v780_v20  ;;  %vm774_vm10 = vmpackc.low %vm760_vm2, %vm1495_vm9  ;;  %vm1663_vm9 = vnez %v1645_v33  ;;  %vm750_vm2 = vcmp.le.f32.partialorder %v734_v11, 32.0 }
 0x226   :  { %vm776_vm1 = vmpackc.even %vm775_vm12, %vm774_vm10  ;;  %vm1669_vm12 = vnez %v1643_v47 }
 0x227   :  { %v782_v52 = vsel %vm776_vm1, 16843009, %v984_v7  ;;  %vm1548_vm11 = vmand %vm1660_vm5, %vm741_vm15  ;;  %vm1672_vm15 = vnez %v1631_v62  ;;  %vm740_vm1 = vcmp.le.f32.partialorder %v724_v38, 32.0 }
 0x228   :  { %786 = vst [vmem:[#allocation3 + $0x10] sm:$0xff] %v782_v52  ;;  %vm1554_vm13 = vmand %vm1663_vm9, %vm749_vm6 }
 0x229   :  { %vm1561_vm4 = vmand %vm1666_vm14, %vm739_vm3  ;;  %vm1673_vm3 = vnez %v1647_v54 }
 0x22a   :  { %vm1567_vm0 = vmand %vm1669_vm12, %vm747_vm7  ;;  %vm1674_vm7 = vnez %v1627_v26  ;;  %vm748_vm12 = vcmp.le.f32.partialorder %v732_v53, 32.0 }
 0x22b   :  { %v1671_v48 = vsel %vm1567_vm0, 4294967295, %v1670_v48  ;;  %vm758_vm10 = vmand %vm1672_vm15, %vm742_vm8 }
 0x22c   :  { %vm772_vm6 = vmpackc.low %vm758_vm10, %vm1548_vm11  ;;  %vm1675_vm11 = vnez %v1641_v46 }
 0x22d   :  { %vm766_vm5 = vmand %vm1673_vm3, %vm750_vm2  ;;  %vm1676_vm2 = vnez %v1671_v48 }
 0x22e   :  { %vm778_vm9 = vmpackc.low %vm766_vm5, %vm1554_vm13 }
 0x22f   :  { %vm756_vm14 = vmand %vm1674_vm7, %vm740_vm1 }
 0x230   :  { %vm771_vm0 = vmpackc.low %vm756_vm14, %vm1561_vm4 }
 0x231   :  { %vm773_vm8 = vmpackc.even %vm772_vm6, %vm771_vm0 }
 0x232   :  { %v781_v23 = vsel %vm773_vm8, 16843009, %v984_v7  ;;  %vm764_vm15 = vmand %vm1675_vm11, %vm748_vm12 }
 0x233   :  { %785 = vst [vmem:[#allocation3 + $0x8] sm:$0xff] %v781_v23  ;;  %vm777_vm10 = vmpackc.low %vm764_vm15, %vm1676_vm2 }
 0x234   :  { %vm779_vm13 = vmpackc.even %vm778_vm9, %vm777_vm10 }
 0x235   :  { %v783_v26 = vsel %vm779_vm13, 16843009, %v984_v7 }
 0x236   :  { %787 = vst [vmem:[#allocation3 + $0x18] sm:$0xff] %v783_v26 }
 0x237   :  { %969 = shalt.err (!%p966_p4)
}
 0x238   :  { %s970_s25 = scalar_lea.hbm %s1607_s5, 512 }
 0x239   :  { %p971_p5 = scmp.ne.s32.totalorder %s1607_s5, %s970_s25  ;;  %p974_p6 = scmp.lt.u32.totalorder %s970_s25, %s1607_s5 }
 0x23b   :  { %p976_p7 = pnand %p974_p6, %p971_p5 }
 0x23d   :  { %979 = shalt.err (!%p976_p7)
}
 0x23e   :  { %s988_s4 = smov 128   ;;  %s989_s30 = smov 8  }
 0x23f   :  { %799 = dma.vmem_to_hbm [thread:$0]  %s794_s22, 512, %s1607_s5, [#allocation4], %s988_s4, %s988_s4, %s989_s30  }
 0x240   :  { %980 = dma.done.wait [#allocation4], 512  }
 0x241   :  { %981 = vsyncadd [#allocation4], 4294966784 }
 0x242   :  { %803 = vsyncpa [#allocation4], 1 }

</bundles_post_ra>
